<compile_context>
chip_gen: v7x
topology: tpu7x:2x2x1
jax: 0.10.0
libtpu: 0.0.40
codegen_flags: <defaults>
</compile_context>

<pallas_src>
import functools
import math

import jax
import jax.numpy as jnp
from jax.experimental import pallas as pl
from jax.experimental.pallas import tpu as pltpu


# ----------------------------------------------------------------------------
# Pallas kernels
# ----------------------------------------------------------------------------
def _ca_fused_kernel(x_ref, w1t_ref, b1_ref, w2t_ref, b2_ref, o_ref, *, inv_s):
    """Fully fused CA for a (bn, C, S) block: pool + MLP + sigmoid + scale."""
    x = x_ref[...]                                                    # (bn, C, S) native dtype
    # f32 accumulation for the mean; the f32 copy is a transient of the
    # reduction only (not retained for the final multiply).
    mean = jnp.sum(x.astype(jnp.float32), axis=2) * inv_s             # (bn, C)
    h = jnp.dot(mean, w1t_ref[...],
                preferred_element_type=jnp.float32) + b1_ref[...]     # (bn, Cr)
    h = jnp.maximum(h, 0.0)
    a = jnp.dot(h, w2t_ref[...],
                preferred_element_type=jnp.float32) + b2_ref[...]     # (bn, C)
    attn = 1.0 / (1.0 + jnp.exp(-a))                                  # (bn, C) f32
    # Scale in the input's native dtype (bf16 stays bf16 on the VPU).
    o_ref[...] = (x * attn[:, :, None].astype(x.dtype)).astype(o_ref.dtype)


def _ca_psum_kernel(x_ref, psum_ref, *, ts, s_total, tiles_per_chunk, need_mask):
    """Pass 1: accumulate spatial partial sums into a (1, 1, C, 1) block.

      x block    : (1, C, ts)      grid = (N, P, tiles_per_chunk)
      psum block : (1, 1, C, 1)    resident across the (arbitrary) tile axis
    """
    k = pl.program_id(2)

    @pl.when(k == 0)
    def _():
        psum_ref[...] = jnp.zeros_like(psum_ref)

    x = x_ref[0].astype(jnp.float32)                                  # (C, ts)
    if need_mask:
        # Ragged spatial extent and/or chunk overhang: zero the lanes that do
        # not belong to this tile's [g*ts, s_total) range (OOB reads are
        # unspecified; redundant clamped tiles mask to all-False -> add 0).
        j = pl.program_id(1)
        g = j * tiles_per_chunk + k                                   # global tile index
        lane = jax.lax.broadcasted_iota(jnp.int32, x.shape, 1)
        x = jnp.where(g * ts + lane < s_total, x, 0.0)
    psum_ref[0, 0] += jnp.sum(x, axis=1, keepdims=True)               # (C, 1)


def _ca_scale_kernel(x_ref, attn_ref, o_ref):
    """Pass 2: out = x * attn, broadcast over the spatial/lane axis, in the
    input's native dtype.  OOB lanes of a ragged last tile are dropped on
    writeback."""
    a = attn_ref[...].astype(x_ref.dtype)                             # (1, C, 1)
    o_ref[...] = (x_ref[...] * a).astype(o_ref.dtype)


# ----------------------------------------------------------------------------
# Generation-aware sizing helpers
# ----------------------------------------------------------------------------
def _tpu_vmem_bytes():
    try:
        info = pltpu.get_tpu_info()
        return int(getattr(info, "vmem_capacity_bytes", 128 * 1024 * 1024))
    except Exception:  # pragma: no cover - conservative fallback
        return 128 * 1024 * 1024


def _budgets():
    """(vmem_limit_bytes, fused per-block working-set budget, pass-2 tile bytes)."""
    vmem = _tpu_vmem_bytes()
    if vmem <= 64 * 1024 * 1024:
        # v7x-class: 64 MiB physical VMEM per TensorCore.
        return min(vmem * 3 // 4, 48 << 20), 28 << 20, 2 << 20
    # v5e / v6e: 128 MiB physical VMEM.
    return 96 << 20, 64 << 20, 4 << 20


def _fused_per_image_bytes(c, s, itemsize):
    # in (x2 double-buffered) + out (x2) in native dtype + transient f32 copy
    # feeding the mean reduction.
    return c * s * (4 * itemsize + 4)


def _pick_batch_pack(n, per_image_bytes, budget):
    """Largest bn dividing n with bn*per_image <= budget; keep >=2 grid steps
    when n >= 2 so both v7x TensorCores have work."""
    bn = max(1, min(n, budget // max(per_image_bytes, 1)))
    if n >= 2:
        bn = max(1, min(bn, n // 2))
    while n % bn:
        bn -= 1
    return bn


def _pick_spatial_tile(s, c, itemsize, target_bytes):
    """Tile (multiple of 128 lanes) sized so one (1, C, ts) block is ~target
    bytes in native dtype; full extent if the whole row already fits."""
    ts = max(128, (target_bytes // max(c * itemsize, 1)) // 128 * 128)
    if ts >= s:
        return s, 1
    return ts, -(-s // ts)


# ----------------------------------------------------------------------------
# Wrapper
# ----------------------------------------------------------------------------
def ca_forward(params, x, *, force_two_pass=False, spatial_tile=None):
    """Channel attention forward. x: (N, C, H, W) -> (N, C, H, W)."""
    n, c, h, w = x.shape
    s = h * w
    xs = x.reshape(n, c, s)                       # free view, NCHW stays put
    w1t, b1, w2t, b2 = params["w1t"], params["b1"], params["w2t"], params["b2"]
    cr = w1t.shape[1]
    itemsize = x.dtype.itemsize
    inv_s = 1.0 / s
    vmem_limit, slab_budget, tile_target = _budgets()

    per_image = _fused_per_image_bytes(c, s, itemsize)

    if (not force_two_pass) and per_image <= slab_budget:
        # ------------------------------------------------------------------
        # Fused path: x read once, written once (2x HBM traffic).
        # ------------------------------------------------------------------
        bn = _pick_batch_pack(n, per_image, slab_budget)
        weight_specs = [
            pl.BlockSpec((c, cr), lambda i: (0, 0)),    # W1^T
            pl.BlockSpec((1, cr), lambda i: (0, 0)),    # b1
            pl.BlockSpec((cr, c), lambda i: (0, 0)),    # W2^T
            pl.BlockSpec((1, c), lambda i: (0, 0)),     # b2
        ]
        out = pl.pallas_call(
            functools.partial(_ca_fused_kernel, inv_s=inv_s),
            out_shape=jax.ShapeDtypeStruct((n, c, s), x.dtype),
            grid=(n // bn,),
            in_specs=[pl.BlockSpec((bn, c, s), lambda i: (i, 0, 0))]
            + weight_specs,
            out_specs=pl.BlockSpec((bn, c, s), lambda i: (i, 0, 0)),
            compiler_params=pltpu.CompilerParams(
                dimension_semantics=("parallel",),
                vmem_limit_bytes=vmem_limit),
        )(xs, w1t, b1, w2t, b2)
        return out.reshape(n, c, h, w)

    # ----------------------------------------------------------------------
    # Two-pass path: bounded VMEM, pipelined, handles ragged H*W via masking.
    # ----------------------------------------------------------------------
    if spatial_tile is None:
        ts, nt = _pick_spatial_tile(s, c, itemsize, tile_target)
    else:
        ts = min(int(spatial_tile), s)
        nt = -(-s // ts)

    # Split the spatial axis into P parallel chunks when N == 1 so pass 1 can
    # use both v7x TensorCores; harmless elsewhere.
    p = 2 if (n == 1 and nt >= 2) else 1
    tpc = -(-nt // p)                       # tiles per chunk
    need_mask = (ts * tpc * p != s)         # ragged tail and/or chunk overhang

    # Clamp the block index so redundant overhang tiles map to the last valid
    # tile (their contribution is masked to zero in the kernel).
    x_map = lambda i, j, k: (i, 0, jnp.minimum(j * tpc + k, nt - 1))

    psum = pl.pallas_call(
        functools.partial(_ca_psum_kernel, ts=ts, s_total=s,
                          tiles_per_chunk=tpc, need_mask=need_mask),
        out_shape=jax.ShapeDtypeStruct((n, p, c, 1), jnp.float32),
        grid=(n, p, tpc),
        in_specs=[pl.BlockSpec((1, c, ts), x_map)],
        out_specs=pl.BlockSpec((1, 1, c, 1), lambda i, j, k: (i, j, 0, 0)),
        compiler_params=pltpu.CompilerParams(
            dimension_semantics=("parallel", "parallel", "arbitrary"),
            vmem_limit_bytes=vmem_limit),
    )(xs)

    # Tiny (N, C) combine + MLP + sigmoid in plain JAX — negligible next to
    # the HBM-bound passes.
    mean = jnp.sum(psum[..., 0], axis=1) * inv_s                      # (N, C)
    hmid = jnp.maximum(mean @ w1t + b1, 0.0)                          # (N, Cr)
    attn = jax.nn.sigmoid(hmid @ w2t + b2).astype(jnp.float32)        # (N, C)
    attn = attn[:, :, None]                                           # (N, C, 1)

    out = pl.pallas_call(
        _ca_scale_kernel,
        out_shape=jax.ShapeDtypeStruct((n, c, s), x.dtype),
        grid=(n, nt),
        in_specs=[
            pl.BlockSpec((1, c, ts), lambda i, k: (i, 0, k)),
            pl.BlockSpec((1, c, 1), lambda i, k: (i, 0, 0)),
        ],
        out_specs=pl.BlockSpec((1, c, ts), lambda i, k: (i, 0, k)),
        compiler_params=pltpu.CompilerParams(
            dimension_semantics=("parallel", "parallel"),
            vmem_limit_bytes=vmem_limit),
    )(xs, attn)
    return out.reshape(n, c, h, w)


# ----------------------------------------------------------------------------
# Pure-JAX reference (matches the PyTorch module semantics)
# ----------------------------------------------------------------------------
def ca_reference(params, x):
    xf = x.astype(jnp.float32)
    mean = jnp.mean(xf, axis=(2, 3))                                  # (N, C)
    h = jnp.maximum(mean @ params["w1t"] + params["b1"], 0.0)         # (N, Cr)
    a = h @ params["w2t"] + params["b2"]                              # (N, C)
    scale = jax.nn.sigmoid(a)
    return (xf * scale[:, :, None, None]).astype(x.dtype)


# ----------------------------------------------------------------------------
# Deterministic parameters (weights pre-reshaped to kernel layouts at build time)
# ----------------------------------------------------------------------------
def build_params(key, num_features=64, reduction=16):
    c = num_features
    cr = num_features // reduction
    k1, k2, k3, k4 = jax.random.split(key, 4)
    s1 = 1.0 / math.sqrt(c)    # fan-in scaling for conv1 (in=C)
    s2 = 1.0 / math.sqrt(cr)   # fan-in scaling for conv2 (in=Cr)
    return {
        # conv1 weight W1: (Cr, C, 1, 1) in torch -> stored as W1^T (C, Cr)
        "w1t": jax.random.normal(k1, (c, cr), jnp.float32) * s1,
        "b1": jax.random.normal(k2, (1, cr), jnp.float32) * s1,
        # conv2 weight W2: (C, Cr, 1, 1) in torch -> stored as W2^T (Cr, C)
        "w2t": jax.random.normal(k3, (cr, c), jnp.float32) * s2,
        "b2": jax.random.normal(k4, (1, c), jnp.float32) * s2,
    }


# ----------------------------------------------------------------------------
if __name__ == "__main__":
    key = jax.random.PRNGKey(0)
    k_param, k_x1, k_x2 = jax.random.split(key, 3)
    params = build_params(k_param, num_features=64, reduction=16)

    # Small NCHW input, consistent with the module defaults (num_features=64).
    x = jax.random.normal(k_x1, (2, 64, 16, 16), jnp.float32)
    ref = ca_reference(params, x)
    out_fused = jax.block_until_ready(jax.jit(ca_forward)(params, x))
    assert out_fused.shape == x.shape, out_fused.shape
    assert jnp.all(jnp.isfinite(out_fused))
    assert jnp.allclose(out_fused, ref, rtol=1e-5, atol=1e-5), float(
        jnp.max(jnp.abs(out_fused - ref)))

    # Force the tiled two-pass path on a ragged spatial size with N == 1:
    # exercises the iota masking and the dual parallel-chunk pass-1 split.
    x2 = jax.random.normal(k_x2, (1, 64, 19, 21), jnp.float32)
    ref2 = ca_reference(params, x2)
    fwd_tiled = jax.jit(functools.partial(
        ca_forward, force_two_pass=True, spatial_tile=128))
    out_tiled = jax.block_until_ready(fwd_tiled(params, x2))
    assert out_tiled.shape == x2.shape, out_tiled.shape
    assert jnp.all(jnp.isfinite(out_tiled))
    assert jnp.allclose(out_tiled, ref2, rtol=1e-5, atol=1e-5), float(
        jnp.max(jnp.abs(out_tiled - ref2)))

    print("KERNEL_OK")
</pallas_src>

<mosaic_0001>
module attributes {stable_mosaic.version = 11 : i64} {
  func.func @_ca_fused_kernel(%arg0: i32, %arg1: memref<1x64x256xf32, #tpu.memory_space<vmem>>, %arg2: memref<64x4xf32, #tpu.memory_space<vmem>>, %arg3: memref<1x4xf32, #tpu.memory_space<vmem>>, %arg4: memref<4x64xf32, #tpu.memory_space<vmem>>, %arg5: memref<1x64xf32, #tpu.memory_space<vmem>>, %arg6: memref<1x64x256xf32, #tpu.memory_space<vmem>>) attributes {dimension_semantics = [#tpu.dimension_semantics<parallel>], iteration_bounds = array<i64: 2>, scalar_prefetch = 0 : i64, scratch_operands = 0 : i64, tpu.core_type = #tpu.core_type<tc>, window_params = [{transform_indices = @transform_0, window_bounds = array<i64: 1, 64, 256>}, {pipeline_mode = #tpu.pipeline_mode<synchronous>, transform_indices = @transform_1, window_bounds = array<i64: 64, 4>}, {pipeline_mode = #tpu.pipeline_mode<synchronous>, transform_indices = @transform_2, window_bounds = array<i64: 1, 4>}, {pipeline_mode = #tpu.pipeline_mode<synchronous>, transform_indices = @transform_3, window_bounds = array<i64: 4, 64>}, {pipeline_mode = #tpu.pipeline_mode<synchronous>, transform_indices = @transform_4, window_bounds = array<i64: 1, 64>}, {transform_indices = @transform_5, window_bounds = array<i64: 1, 64, 256>}]} {
    %c0 = arith.constant 0 : index
    %c0_0 = arith.constant 0 : index
    %c0_1 = arith.constant 0 : index
    %0 = vector.load %arg1[%c0, %c0_0, %c0_1] : memref<1x64x256xf32, #tpu.memory_space<vmem>>, vector<1x64x256xf32>
    %cst = arith.constant dense<0.000000e+00> : vector<1x64xf32>
    %1 = vector.multi_reduction <add>, %0, %cst [2] : vector<1x64x256xf32> to vector<1x64xf32>
    %cst_2 = arith.constant 3.906250e-03 : f32
    %2 = vector.broadcast %cst_2 : f32 to vector<1x64xf32>
    %3 = arith.mulf %1, %2 : vector<1x64xf32>
    %c0_3 = arith.constant 0 : index
    %c0_4 = arith.constant 0 : index
    %4 = vector.load %arg2[%c0_3, %c0_4] : memref<64x4xf32, #tpu.memory_space<vmem>>, vector<64x4xf32>
    %cst_5 = arith.constant dense<0.000000e+00> : vector<1x4xf32>
    %5 = tpu.matmul %3, %4, %cst_5 {dimension_numbers = #tpu.dot_dimension_numbers<[1], [0], [0], [1], [0, 0, 1, 1], [], []>} : vector<1x64xf32>, vector<64x4xf32>, vector<1x4xf32> -> vector<1x4xf32>
    %c0_6 = arith.constant 0 : index
    %c0_7 = arith.constant 0 : index
    %6 = vector.load %arg3[%c0_6, %c0_7] : memref<1x4xf32, #tpu.memory_space<vmem>>, vector<1x4xf32>
    %7 = arith.addf %5, %6 : vector<1x4xf32>
    %cst_8 = arith.constant 0.000000e+00 : f32
    %8 = vector.broadcast %cst_8 : f32 to vector<1x4xf32>
    %9 = arith.maximumf %7, %8 : vector<1x4xf32>
    %c0_9 = arith.constant 0 : index
    %c0_10 = arith.constant 0 : index
    %10 = vector.load %arg4[%c0_9, %c0_10] : memref<4x64xf32, #tpu.memory_space<vmem>>, vector<4x64xf32>
    %cst_11 = arith.constant dense<0.000000e+00> : vector<1x64xf32>
    %11 = tpu.matmul %9, %10, %cst_11 {dimension_numbers = #tpu.dot_dimension_numbers<[1], [0], [0], [1], [0, 0, 1, 1], [], []>} : vector<1x4xf32>, vector<4x64xf32>, vector<1x64xf32> -> vector<1x64xf32>
    %c0_12 = arith.constant 0 : index
    %c0_13 = arith.constant 0 : index
    %12 = vector.load %arg5[%c0_12, %c0_13] : memref<1x64xf32, #tpu.memory_space<vmem>>, vector<1x64xf32>
    %13 = arith.addf %11, %12 : vector<1x64xf32>
    %cst_14 = arith.constant 0.000000e+00 : f32
    %14 = vector.broadcast %cst_14 : f32 to vector<1x64xf32>
    %15 = arith.subf %14, %13 : vector<1x64xf32>
    %16 = math.exp %15 : vector<1x64xf32>
    %cst_15 = arith.constant 1.000000e+00 : f32
    %17 = vector.broadcast %cst_15 : f32 to vector<1x64xf32>
    %18 = arith.addf %17, %16 : vector<1x64xf32>
    %cst_16 = arith.constant 1.000000e+00 : f32
    %19 = vector.broadcast %cst_16 : f32 to vector<1x64xf32>
    %20 = arith.divf %19, %18 : vector<1x64xf32>
    %21 = vector.shape_cast %20 : vector<1x64xf32> to vector<1x64x1xf32>
    %22 = vector.broadcast %21 : vector<1x64x1xf32> to vector<1x64x256xf32>
    %23 = arith.mulf %0, %22 : vector<1x64x256xf32>
    %c0_17 = arith.constant 0 : index
    %c0_18 = arith.constant 0 : index
    %c0_19 = arith.constant 0 : index
    %24 = vector.load %arg6[%c0_17, %c0_18, %c0_19] : memref<1x64x256xf32, #tpu.memory_space<vmem>>, vector<1x64x256xf32>
    tpu.vector_store %arg6[%c0_17, %c0_18, %c0_19], %23 {strides = array<i32>} : memref<1x64x256xf32, #tpu.memory_space<vmem>>, vector<1x64x256xf32>,
    return
  }
  func.func @transform_0(%arg0: i32) -> (i32, i32, i32) {
    %c0_i32 = arith.constant 0 : i32
    %c0_i32_0 = arith.constant 0 : i32
    %c0_i32_1 = arith.constant 0 : i32
    return %arg0, %c0_i32, %c0_i32_0 : i32, i32, i32
  }
  func.func @transform_1(%arg0: i32) -> (i32, i32) {
    %c0_i32 = arith.constant 0 : i32
    %c0_i32_0 = arith.constant 0 : i32
    %c0_i32_1 = arith.constant 0 : i32
    return %c0_i32, %c0_i32_0 : i32, i32
  }
  func.func @transform_2(%arg0: i32) -> (i32, i32) {
    %c0_i32 = arith.constant 0 : i32
    %c0_i32_0 = arith.constant 0 : i32
    %c0_i32_1 = arith.constant 0 : i32
    return %c0_i32, %c0_i32_0 : i32, i32
  }
  func.func @transform_3(%arg0: i32) -> (i32, i32) {
    %c0_i32 = arith.constant 0 : i32
    %c0_i32_0 = arith.constant 0 : i32
    %c0_i32_1 = arith.constant 0 : i32
    return %c0_i32, %c0_i32_0 : i32, i32
  }
  func.func @transform_4(%arg0: i32) -> (i32, i32) {
    %c0_i32 = arith.constant 0 : i32
    %c0_i32_0 = arith.constant 0 : i32
    %c0_i32_1 = arith.constant 0 : i32
    return %c0_i32, %c0_i32_0 : i32, i32
  }
  func.func @transform_5(%arg0: i32) -> (i32, i32, i32) {
    %c0_i32 = arith.constant 0 : i32
    %c0_i32_0 = arith.constant 0 : i32
    %c0_i32_1 = arith.constant 0 : i32
    return %arg0, %c0_i32, %c0_i32_0 : i32, i32, i32
  }
}

</mosaic_0001>

<bundles_post_ra>
// kernel: ca_forward.1
= control target key start
LH: loop header
LB: loop body
LE: loop exit
PB: predicated region body
PF: predicated region fallthrough
CT: control target
= control target key end

     0   :  { %10 = vsyncpa [#allocation3], 0  ;;  %s1598_s0 = inlined_call_operand.hbm [shape: f32[2,64,256], index: 0, kind: input, shape index: {}]   ;;  %s1599_s1 = inlined_call_operand.hbm [shape: f32[64,4], index: 1, kind: input, shape index: {}]   ;;  %s1600_s2 = inlined_call_operand.hbm [shape: f32[1,4], index: 2, kind: input, shape index: {}]   ;;  %s1601_s3 = inlined_call_operand.hbm [shape: f32[4,64], index: 3, kind: input, shape index: {}]   ;;  %s1602_s4 = inlined_call_operand.hbm [shape: f32[1,64], index: 4, kind: input, shape index: {}]   ;;  %s1603_s5 = inlined_call_operand.hbm [shape: f32[2,64,256], index: 5, kind: output, shape index: {}]  }
   0x1   :  { %12 = vsyncpa [#allocation3 + $0x1], 0 }
   0x2   :  { %13 = vsyncpa [#allocation6], 0 }
   0x3   :  { %14 = vsyncpa [#allocation9], 0 }
   0x4   :  { %15 = vsyncpa [#allocation4], 0 }
   0x5   :  { %17 = vsyncpa [#allocation4 + $0x1], 0  ;;  %s1204_s18 = smov 0   ;;  %s1206_s19 = smov 0  }
   0x6   :  { %s1208_s20 = smov 0   ;;  %s1210_s21 = smov 0  }
   0x7 LB: > { %s1225_s22 = sadd.s32 4294967295, %s1157_s21   ;;  %s767_s23 = sadd.s32 4294967294, %s1157_s21   ;;  %s1157_s21 = sphi %s1210_s21, %s1626_s21   ;;  %s1153_s20 = sphi %s1208_s20, %s1625_s20   ;;  %s1149_s19 = sphi %s1206_s19, %s1624_s19   ;;  %s1145_s18 = sphi %s1204_s18, %s1623_s18  }
   0x8   : > { %p43_p0 = scmp.ne.s32.totalorder %s1149_s19, %s1145_s18  ;;  %p1604_p1 = scmp.eq.s32.totalorder %s1225_s22, 0 }
   0x9   : > { %p157_p3 = scmp.eq.s32.totalorder %s767_s23, 1  ;;  %p768_p5 = scmp.ge.s32.totalorder %s1157_s21, 1 }
   0xa   : > { %p1234_p4 = por %p1604_p1, %p43_p0  ;;  %p164_p7 = scmp.lt.s32.totalorder %s1157_s21, 3 }
   0xb   : > { %p1239_p6 = por %p157_p3, %p43_p0  ;;  %s1159_s27 = smov [#allocation5]  }
   0xc   : > { %s1607_s24 = scalar_select %p1234_p4, 1, 0 }
   0xd   : > { %s1608_s25 = scalar_select %p1239_p6, 1, 0 }
   0xe   : > { %p1244_p8 = pnand %p768_p5, %p164_p7  ;;  %s176_s28 = sshll.u32 %s1159_s27, 4  ;;  %s1248_s28 = int_to_ptr.vmem [resolvable:$true] %s176_s28 }
   0xf   : > { %s1160_s30 = smov [#allocation8]   ;;  %s1161_s7 = smov [#allocation7]  }
  0x10   : > { %s1609_s26 = scalar_select %p1244_p8, 1, 0 }
  0x11   : > { %p861_p9 = pneg %p1244_p8  ;;  %s201_s6 = sshll.u32 %s1160_s30, 4  ;;  %s1259_s6 = int_to_ptr.vmem [resolvable:$true] %s201_s6 }
  0x12   : > { %s1261_s8 = sshll.u32 %s1161_s7, 4  ;;  %s941_s11 = scalar_lea.hbm %s1599_s1, 1024  ;;  %s191_s8 = int_to_ptr.vmem [resolvable:$true] %s1261_s8 }
  0x13   : > { %p1255_p11 = pnand %p861_p9, %p1604_p1  ;;  %p942_p12 = scmp.ne.s32.totalorder %s1599_s1, %s941_s11 }
  0x14   : > { %p948_p5 = scmp.lt.u32.totalorder %s941_s11, %s1599_s1 }
  0x15   : > { %p1271_p13 = pneg %p1255_p11 }
  0x17   : > { %p944_p0 = pnand %p1271_p13, %p942_p12 }
  0x19   : > { %p945_p3 = pneg %p944_p0 }
  0x1b   : > { %p950_p7 = pnand %p948_p5, %p945_p3 }
  0x1d   : > { %953 = shalt.err (!%p950_p7)
}
  0x1e   : > { %s954_s17 = scalar_lea.vmem %s1248_s28, 1024  ;;  %p962_p2 = scmp.lt.s32.totalorder %s1248_s28, %s1248_s28 }
  0x1f   : > { %p955_p9 = scmp.ne.s32.totalorder %s1248_s28, %s954_s17  ;;  %p963_p6 = scmp.lt.s32.totalorder %s954_s17, %s954_s17 }
  0x21   : > { %p957_p10 = pnand %p955_p9, %p1271_p13  ;;  %p964_p12 = por %p963_p6, %p962_p2 }
  0x23   : > { %p958_p1 = pneg %p957_p10 }
  0x25   : > { %p965_p0 = pnand %p964_p12, %p958_p1 }
  0x27   : > { %968 = shalt.err (!%p965_p0)
}
  0x28   : > { %s1162_s23 = smov 128   ;;  %s1163_s27 = smov 8  }
  0x29   : > { %864 = dma.hbm_to_vmem [thread:$0]  (!%p1255_p11), %s1599_s1, 1024, %s1248_s28, [#allocation6], %s1162_s23, %s1162_s23, %s1163_s27  }
  0x2a   : > { %s969_s11 = scalar_lea.hbm %s1601_s3, 64 }
  0x2b   : > { %p970_p2 = scmp.ne.s32.totalorder %s1601_s3, %s969_s11  ;;  %p976_p10 = scmp.lt.u32.totalorder %s969_s11, %s1601_s3 }
  0x2d   : > { %p972_p1 = pnand %p970_p2, %p1271_p13 }
  0x2f   : > { %p973_p6 = pneg %p972_p1 }
  0x31   : > { %p978_p3 = pnand %p976_p10, %p973_p6 }
  0x33   : > { %981 = shalt.err (!%p978_p3)
}
  0x34   : > { %s982_s28 = scalar_lea.vmem %s1259_s6, 64  ;;  %p990_p12 = scmp.lt.s32.totalorder %s1259_s6, %s1259_s6 }
  0x35   : > { %p983_p5 = scmp.ne.s32.totalorder %s1259_s6, %s982_s28  ;;  %p991_p0 = scmp.lt.s32.totalorder %s982_s28, %s982_s28 }
  0x37   : > { %p985_p7 = pnand %p983_p5, %p1271_p13  ;;  %p992_p2 = por %p991_p0, %p990_p12 }
  0x39   : > { %p986_p9 = pneg %p985_p7 }
  0x3b   : > { %p993_p1 = pnand %p992_p2, %p986_p9 }
  0x3d   : > { %996 = shalt.err (!%p993_p1)
}
  0x3e   : > { %870 = dma.hbm_to_vmem [thread:$0]  (!%p1255_p11), %s1601_s3, 64, %s1259_s6, [#allocation9]  }
  0x3f   : > { %s997_s7 = scalar_lea.hbm %s1600_s2, 16 }
  0x40   : > { %p998_p6 = scmp.ne.s32.totalorder %s1600_s2, %s997_s7  ;;  %p1004_p5 = scmp.lt.u32.totalorder %s997_s7, %s1600_s2 }
  0x42   : > { %p1000_p10 = pnand %p998_p6, %p1271_p13 }
  0x44   : > { %p1001_p3 = pneg %p1000_p10 }
  0x46   : > { %p1006_p7 = pnand %p1004_p5, %p1001_p3 }
  0x48   : > { %1009 = shalt.err (!%p1006_p7)
}
  0x49   : > { %s1010_s13 = scalar_lea.vmem %s191_s8, 16  ;;  %s1017_s6 = scalar_lea.vmem %s191_s8, 32 }
  0x4a   : > { %p1011_p9 = scmp.ne.s32.totalorder %s191_s8, %s1010_s13  ;;  %p1018_p2 = scmp.lt.s32.totalorder %s191_s8, %s191_s8 }
  0x4b   : > { %p1019_p1 = scmp.lt.s32.totalorder %s1017_s6, %s1010_s13 }
  0x4c   : > { %p1013_p12 = pnand %p1011_p9, %p1271_p13 }
  0x4d   : > { %p1020_p4 = por %p1019_p1, %p1018_p2 }
  0x4e   : > { %p1014_p0 = pneg %p1013_p12 }
  0x50   : > { %p1021_p8 = pnand %p1020_p4, %p1014_p0 }
  0x52   : > { %1024 = shalt.err (!%p1021_p8)
}
  0x53   : > { %867 = dma.hbm_to_vmem [thread:$0]  (!%p1255_p11), %s1600_s2, 16, %s191_s8, [#allocation6]  }
  0x54   : > { %s1164_s28 = smov [#allocation10]   ;;  %s1025_s30 = scalar_lea.hbm %s1602_s4, 16 }
  0x55   : > { %s212_s17 = sshll.u32 %s1164_s28, 4  ;;  %p1026_p6 = scmp.ne.s32.totalorder %s1602_s4, %s1025_s30  ;;  %s213_s17 = int_to_ptr.vmem [resolvable:$true] %s212_s17 }
  0x56   : > { %p1032_p10 = scmp.lt.u32.totalorder %s1025_s30, %s1602_s4 }
  0x57   : > { %p1028_p4 = pnand %p1026_p6, %p1271_p13 }
  0x59   : > { %p1029_p8 = pneg %p1028_p4 }
  0x5b   : > { %p1034_p3 = pnand %p1032_p10, %p1029_p8 }
  0x5d   : > { %1037 = shalt.err (!%p1034_p3)
}
  0x5e   : > { %s1038_s8 = scalar_lea.vmem %s213_s17, 16  ;;  %s1045_s12 = scalar_lea.vmem %s213_s17, 32 }
  0x5f   : > { %p1039_p5 = scmp.ne.s32.totalorder %s213_s17, %s1038_s8  ;;  %p1046_p12 = scmp.lt.s32.totalorder %s213_s17, %s213_s17 }
  0x60   : > { %p1047_p0 = scmp.lt.s32.totalorder %s1045_s12, %s1038_s8 }
  0x61   : > { %p1041_p7 = pnand %p1039_p5, %p1271_p13 }
  0x62   : > { %p1048_p2 = por %p1047_p0, %p1046_p12 }
  0x63   : > { %p1042_p9 = pneg %p1041_p7 }
  0x65   : > { %p1049_p1 = pnand %p1048_p2, %p1042_p9 }
  0x67   : > { %1052 = shalt.err (!%p1049_p1)
}
  0x68   : > { %873 = dma.hbm_to_vmem [thread:$0]  (!%p1255_p11), %s1602_s4, 16, %s213_s17, [#allocation9]  }
  0x69   : > { %s1353_s14 = sadd.s32 1, %s1157_s21   ;;  %s30_s15 = sadd.s32 1, %s1153_s20 }
  0x6a   : > { %s27_s29 = ssub.s32 %s1157_s21, %s1353_s14  ;;  %p37_p13 = scmp.ne.s32.totalorder %s1153_s20, %s1149_s19 }
  0x6b   : > { %p28_p6 = scmp.eq.s32.totalorder %s27_s29, 0  ;;  %p38_p4 = scmp.eq.s32.totalorder %s1157_s21, 0 }
  0x6c   : > { %p1612_p8 = scmp.eq.s32.totalorder %s1225_s22, 1  ;;  %p886_p3 = scmp.lt.s32.totalorder %s1157_s21, 2 }
  0x6d   : > { %s1369_s28 = scalar_select %p28_p6, %s1153_s20, %s30_s15  }
  0x6e   : > { %p1363_p10 = por %p1612_p8, %p37_p13  ;;  %p39_p5 = por %p38_p4, %p37_p13 }
  0x6f   : > { %s223_s23 = sand.u32 1, %s1153_s20   ;;  %s792_s17 = sshll.u32 %s1157_s21, 11 }
  0x70   : > { %s774_s27 = sshll.u32 %s223_s23, 7  ;;  %s1376_s9 = scalar_lea.hbm %s1598_s0, %s792_s17 }
  0x71   : > { %s227_s10 = scalar_lea.vmem [#allocation2], %s774_s27  ;;  %p1380_p11 = pnand %p886_p3, %p39_p5 }
  0x72   : > { %s234_s11 = sshll.u32 %s227_s10, 4  ;;  %s1384_s12 = scalar_lea.sflag [#allocation3], %s223_s23  ;;  %s1378_s11 = int_to_ptr.vmem [resolvable:$true] %s234_s11 }
  0x73   : > { %s1053_s13 = scalar_lea.hbm %s1376_s9, 2048  ;;  %p1055_p9 = pneg %p1380_p11 }
  0x74   : > { %p1054_p7 = scmp.ne.s32.totalorder %s1376_s9, %s1053_s13  ;;  %s1058_s29 = scalar_lea.hbm %s1598_s0, 4096 }
  0x75   : > { %p1059_p2 = scmp.lt.u32.totalorder %s1376_s9, %s1598_s0  ;;  %p1060_p1 = scmp.lt.u32.totalorder %s1058_s29, %s1053_s13 }
  0x76   : > { %p1056_p12 = pnand %p1055_p9, %p1054_p7  ;;  %p1062_p6 = scmp.lt.u32.totalorder %s1053_s13, %s1376_s9 }
  0x77   : > { %p1061_p13 = por %p1060_p1, %p1059_p2 }
  0x78   : > { %p1057_p0 = pneg %p1056_p12 }
  0x79   : > { %p1063_p4 = por %p1062_p6, %p1061_p13 }
  0x7b   : > { %p1064_p8 = pnand %p1063_p4, %p1057_p0 }
  0x7d   : > { %1067 = shalt.err (!%p1064_p8)
}
  0x7e   : > { %s1068_s23 = scalar_lea.vmem %s1378_s11, 2048  ;;  %s1165_s30 = smov [#allocation2]  }
  0x7f   : > { %p1069_p3 = scmp.ne.s32.totalorder %s1378_s11, %s1068_s23  ;;  %s1073_s7 = sshll.u32 %s1165_s30, 4  ;;  %s1074_s7 = int_to_ptr.vmem [resolvable:$false] %s1073_s7 }
  0x80   : > { %s1075_s10 = scalar_lea.vmem %s1074_s7, 4096  ;;  %p1076_p12 = scmp.lt.s32.totalorder %s1378_s11, %s1074_s7 }
  0x81   : > { %p1071_p5 = pnand %p1069_p3, %p1055_p9  ;;  %p1077_p2 = scmp.lt.s32.totalorder %s1075_s10, %s1068_s23 }
  0x83   : > { %p1072_p7 = pneg %p1071_p5  ;;  %p1078_p1 = por %p1077_p2, %p1076_p12 }
  0x85   : > { %p1079_p13 = pnand %p1078_p1, %p1072_p7 }
  0x87   : > { %1082 = shalt.err (!%p1079_p13)
}
  0x88   : > { %s1166_s13 = smov 256   ;;  %s1167_s6 = smov 16  }
  0x89   : > { %877 = dma.hbm_to_vmem [thread:$0]  (!%p1380_p11), %s1376_s9, 2048, %s1378_s11, %s1384_s12, %s1166_s13, %s1166_s13, %s1167_s6  }
  0x8a   : > { %p1615_p9 = scmp.ne.s32.totalorder %s1609_s26, 0 }
  0x8b   : > { %s1415_s15 = sand.u32 (!%p1615_p9), 1, %s1149_s19   ;;  %p1616_p0 = scmp.ne.s32.totalorder (!%p1615_p9), %s1607_s24, 0 }
  0x8c   : > { %246 = sbr.rel (%p1615_p9) target bundleno = 926 (0x39e), region = 40  ;;  %s778_s29 = sshll.u32 (!%p1615_p9), %s1415_s15, 7 }
  0x8d   : > { %s249_s27 = scalar_lea.sflag (!%p1615_p9), [#allocation3], %s1415_s15  ;;  %s1421_s17 = scalar_lea.vmem (!%p1615_p9), [#allocation2], %s778_s29 }
  0x93   : > { %1128 = dma.done.wait (%p1616_p0), %s249_s27, 2048  }
  0x94   : > { %1130 = vsyncadd (%p1616_p0), %s249_s27, 4294965248  ;;  %p1617_p11 = scmp.eq.s32.totalorder %s1225_s22, 0 }
  0x96   : > { %1132 = dma.done.wait (%p1617_p11), [#allocation6], 1040   ;;  %p1618_p6 = pmov %p1617_p11 }
  0x98   : > { %1134 = vsyncadd (%p1618_p6), [#allocation6], 4294966256  ;;  %p1619_p4 = pmov %p1618_p6 }
  0x9a   : > { %1136 = dma.done.wait (%p1619_p4), [#allocation9], 80   ;;  %p1620_p8 = pmov %p1619_p4 }
  0x9b   : > { %v1436_v0 = vld [vmem:[%s1421_s17] sm:$0xff]  ;;  %v1439_v1 = vld [vmem:[%s1421_s17 + $0x8] sm:$0xff]  ;;  %v1450_v5 = vld [vmem:[%s1421_s17 + $0x10] sm:$0xff]  ;;  %v1168_v27 = vmov 0.0|0.0   ;;  %vm1169_vm0 = vmmov 0   ;;  %v1170_v37 = vmov 0.0   ;;  %v360_v38 = vlaneseq }
  0x9c   : > { %1138 = vsyncadd (%p1620_p8), [#allocation9], 4294967216  ;;  %v1442_v2 = vld [vmem:[%s1421_s17 + $0x20] sm:$0xff]  ;;  %v311_v3 = vadd.f32 %v1439_v1, %v1436_v0  ;;  %v1447_v4 = vld [vmem:[%s1421_s17 + $0x28] sm:$0xff]  ;;  %829 = vmatprep.subr.bf16.mxu0 %v1168_v27  ;;  %821 = vmatprep.mubr.msk.f32.mxu0 %vm1169_vm0, %v1170_v37  ;;  %vm371_vm1 = vcmask 130112   ;;  %vm378_vm2 = vcmask 195712  }
  0x9d   : > { %v1453_v6 = vld [vmem:[%s1421_s17 + $0x18] sm:$0xff]  ;;  %v317_v7 = vadd.f32 %v1447_v4, %v1442_v2  ;;  %v1458_v8 = vld [vmem:[%s1421_s17 + $0x30] sm:$0xff]  ;;  %v1468_v12 = vld [vmem:[%s1421_s17 + $0x40] sm:$0xff]  ;;  %824 = vmatprep.subr.mxu1 %v1170_v37  ;;  %826 = vmatprep.mubr.msk.f32.mxu1 %vm1169_vm0, %v1170_v37  ;;  %v361_v39 = vand.u32 127, %v360_v38  ;;  %v1499_v40 = vshrl.u32 %v360_v38, 7  ;;  %vm385_vm3 = vcmask 261312  }
  0x9e   : > { %v1461_v9 = vld [vmem:[%s1421_s17 + $0x38] sm:$0xff]  ;;  %312 = vadd.xlane.f32.xlu0 %v311_v3  ;;  %v314_v10 = vadd.f32 %v1453_v6, %v1450_v5  ;;  %v1471_v13 = vld [vmem:[%s1421_s17 + $0x48] sm:$0xff]  ;;  %v1474_v14 = vld [vmem:[%s1421_s17 + $0x50] sm:$0xff]  ;;  %vm392_vm4 = vcmask 326912   ;;  %vm399_vm5 = vcmask 392512   ;;  %vm406_vm6 = vcmask 458112  }
  0x9f   : > { %318 = vadd.xlane.f32.xlu1 %v317_v7  ;;  %v320_v11 = vadd.f32 %v1461_v9, %v1458_v8  ;;  %v1477_v15 = vld [vmem:[%s1421_s17 + $0x58] sm:$0xff]  ;;  %v323_v16 = vadd.f32 %v1471_v13, %v1468_v12  ;;  %v1484_v18 = vld [vmem:[%s1421_s17 + $0x60] sm:$0xff]  ;;  %v1487_v19 = vld [vmem:[%s1421_s17 + $0x68] sm:$0xff]  ;;  %v366_v41 = vadd.s32 4294967288, %v361_v39  ;;  %v373_v43 = vadd.s32 4294967280, %v361_v39  ;;  %s1517_s24 = scalar_lea.vmem [#allocation11], %s778_s29 }
  0xa0   : > { %v326_v17 = vadd.f32 %v1477_v15, %v1474_v14  ;;  %v1490_v20 = vld [vmem:[%s1421_s17 + $0x70] sm:$0xff]  ;;  %v1493_v21 = vld [vmem:[%s1421_s17 + $0x78] sm:$0xff]  ;;  %v329_v22 = vadd.f32 %v1487_v19, %v1484_v18  ;;  %v343_v24 = vld [vmem:[#allocation5] sm:$0xff]  ;;  %v380_v44 = vadd.s32 4294967272, %v361_v39  ;;  %v364_v46 = vsub.s32 %v361_v39, %v1499_v40  ;;  %s793_s26 = sshll.u32 %s1225_s22, 11  ;;  %s656_s9 = sshll.u32 %s1517_s24, 4  ;;  %s1550_s9 = int_to_ptr.vmem [resolvable:$true] %s656_s9 }
  0xa1   : > { %v332_v23 = vadd.f32 %v1493_v21, %v1490_v20  ;;  %v344_v25 = vld [vmem:[#allocation5 + $0x8] sm:$0xff]  ;;  %v345_v28 = vld [vmem:[#allocation5 + $0x10] sm:$0xff]  ;;  %v346_v29 = vld [vmem:[#allocation5 + $0x18] sm:$0xff]  ;;  %v369_v48 = vsub.s32 %v366_v41, %v1499_v40  ;;  %v387_v49 = vadd.s32 4294967264, %v361_v39  ;;  %v376_v50 = vsub.s32 %v373_v43, %v1499_v40  ;;  %s1548_s12 = scalar_lea.hbm %s1603_s5, %s793_s26  ;;  %s643_s22 = scalar_lea.sflag [#allocation4], %s1415_s15 }
  0xa2   : > { %315 = vadd.xlane.f32.xlu0 %v314_v10  ;;  %v830_v26 = vpack.c.bf16 %v344_v25, %v343_v24  ;;  %v833_v30 = vpack.c.bf16 %v346_v29, %v345_v28  ;;  %v347_v31 = vld [vmem:[#allocation5 + $0x20] sm:$0xff]  ;;  %v348_v32 = vld [vmem:[#allocation5 + $0x28] sm:$0xff]  ;;  %v349_v34 = vld [vmem:[#allocation5 + $0x30] sm:$0xff]  ;;  %v383_v53 = vsub.s32 %v380_v44, %v1499_v40  ;;  %v394_v54 = vadd.s32 4294967256, %v361_v39  ;;  %s1083_s23 = scalar_lea.vmem %s1550_s9, 2048  ;;  %s1171_s30 = smov [#allocation11]  }
  0xa3   : > { %321 = vadd.xlane.f32.xlu1 %v320_v11  ;;  %v836_v33 = vpack.c.bf16 %v348_v32, %v347_v31  ;;  %v350_v35 = vld [vmem:[#allocation5 + $0x38] sm:$0xff]  ;;  %v390_v60 = vsub.s32 %v387_v49, %v1499_v40  ;;  %v401_v61 = vadd.s32 4294967248, %v361_v39  ;;  %v408_v10 = vadd.s32 4294967240, %v361_v39  ;;  %v489_v39 = vld [vmem:[#allocation8] sm:$0xf]  ;;  %p1084_p3 = scmp.ne.s32.totalorder %s1550_s9, %s1083_s23  ;;  %s1087_s7 = sshll.u32 %s1171_s30, 4  ;;  %s1088_s7 = int_to_ptr.vmem [resolvable:$false] %s1087_s7 }
  0xa4   : > { %831 = vmatpush3.bf16.msra.mxu0 %v830_v26  ;;  %v839_v36 = vpack.c.bf16 %v350_v35, %v349_v34  ;;  %v397_v7 = vsub.s32 %v394_v54, %v1499_v40  ;;  %vm413_vm7 = vcmask 523712   ;;  %vm415_vm8 = vcmask 523264   ;;  %v351_v41 = vld [vmem:[#allocation7] sm:$0x1]  ;;  %s1089_s10 = scalar_lea.vmem %s1088_s7, 4096  ;;  %p1090_p12 = scmp.lt.s32.totalorder %s1550_s9, %s1088_s7 }
  0xa5   : > { %832 = vmatprep.subr.bf16.mxu0 %v1168_v27  ;;  %v404_v26 = vsub.s32 %v401_v61, %v1499_v40  ;;  %v411_v29 = vsub.s32 %v408_v10, %v1499_v40  ;;  %vm495_vm9 = vcmask 1043456   ;;  %vm491_vm10 = vcmask 31744   ;;  %p1085_p5 = pnand %p1084_p3, %p1363_p10  ;;  %p1091_p2 = scmp.lt.s32.totalorder %s1089_s10, %s1083_s23 }
  0xa6   : > { %324 = vadd.xlane.f32.xlu0 %v323_v16  ;;  %825 = vmatpush3.msk.msra.mxu1 %vm495_vm9, %v489_v39  ;;  %v577_v54 = vsub.s32 0, %v1499_v40 }
  0xa7   : > { %327 = vadd.xlane.f32.xlu1 %v326_v17  ;;  %p1086_p7 = pneg %p1085_p5  ;;  %p1092_p1 = por %p1091_p2, %p1090_p12 }
  0xa8   : > { %834 = vmatpush3.bf16.msra.mxu0 %v833_v30 }
  0xa9   : > { %835 = vmatprep.subr.bf16.mxu0 %v1168_v27  ;;  %p1093_p13 = pnand %p1092_p1, %p1086_p7 }
  0xaa   : > { %330 = vadd.xlane.f32.xlu0 %v329_v22 }
  0xab   : > { %333 = vadd.xlane.f32.xlu1 %v332_v23 }
  0xac   : > { %837 = vmatpush3.bf16.msra.mxu0 %v836_v33 }
  0xad   : > { %838 = vmatprep.subr.bf16.mxu0 %v1168_v27 }
  0xb0   : > { %840 = vmatpush3.bf16.msra.mxu0 %v839_v36 }
 0x12b   : > { %v313_v42 = vpop.xlane.xlu0 %312 }
 0x12c   : > { %v319_v45 = vpop.xlane.xlu1 %318  ;;  %v335_v47 = vmul.f32 0.00390625, %v313_v42 }
 0x12d   : > { %v337_v51 = vmul.f32 0.00390625, %v319_v45 }
 0x12e   : > { %v365_v58 = vrot.slane %v335_v47, %v364_v46  ;;  %v490_v46 = vld [vmem:[#allocation10] sm:$0x1] }
 0x12f   : > { %v316_v52 = vpop.xlane.xlu0 %315  ;;  %v377_v62 = vrot.slane %v337_v51, %v376_v50 }
 0x130   : > { %v336_v55 = vmul.f32 0.00390625, %v316_v52  ;;  %v322_v56 = vpop.xlane.xlu1 %321 }
 0x131   : > { %v338_v57 = vmul.f32 0.00390625, %v322_v56 }
 0x132   : > { %v370_v59 = vrot.slane %v336_v55, %v369_v48 }
 0x133   : > { %v384_v63 = vrot.slane %v338_v57, %v383_v53  ;;  %v325_v3 = vpop.xlane.xlu0 %324 }
 0x134   : > { %v372_v11 = vsel %vm371_vm1, %v370_v59, %v365_v58  ;;  %v339_v16 = vmul.f32 0.00390625, %v325_v3  ;;  %v328_v17 = vpop.xlane.xlu1 %327 }
 0x135   : > { %v379_v22 = vsel %vm378_vm2, %v377_v62, %v372_v11  ;;  %v340_v23 = vmul.f32 0.00390625, %v328_v17 }
 0x136   : > { %v386_v24 = vsel %vm385_vm3, %v384_v63, %v379_v22  ;;  %v391_v25 = vrot.slane %v339_v16, %v390_v60 }
 0x137   : > { %v398_v27 = vrot.slane %v340_v23, %v397_v7  ;;  %v331_v28 = vpop.xlane.xlu0 %330 }
 0x138   : > { %v393_v30 = vsel %vm392_vm4, %v391_v25, %v386_v24  ;;  %v341_v31 = vmul.f32 0.00390625, %v331_v28  ;;  %v334_v32 = vpop.xlane.xlu1 %333 }
 0x139   : > { %v342_v33 = vmul.f32 0.00390625, %v334_v32  ;;  %v400_v35 = vsel %vm399_vm5, %v398_v27, %v393_v30 }
 0x13a   : > { %v405_v34 = vrot.slane %v341_v31, %v404_v26 }
 0x13b   : > { %v412_v36 = vrot.slane %v342_v33, %v411_v29 }
 0x13c   : > { %v407_v37 = vsel %vm406_vm6, %v405_v34, %v400_v35 }
 0x13d   : > { %v414_v38 = vsel %vm413_vm7, %v412_v36, %v407_v37 }
 0x13e   : > { %822 = vmatmul.mubr.msk.f32.vlgmr.msra.gmra.mrb[0].mxu0 %vm415_vm8, %v414_v38 }
 0x211   : > { %v484_v42 = vpop.f32.mrb[0].mxu0 }
 0x212   : > { %v485_v43 = vadd.f32 %v484_v42, %v351_v41  ;;  %v823_v44 = vpop.f32.mrb[1].mxu0 }
 0x214   : > { %v488_v45 = vmax.f32 %v485_v43, 0.0 }
 0x216   : > { %827 = vmatmul.mubr.msk.f32.vlgmr.msra.gmra.mrb[0].mxu1 %vm491_vm10, %v488_v45 }
 0x2e9   : > { %v565_v47 = vpop.f32.mrb[0].mxu1 }
 0x2ea   : > { %v566_v48 = vadd.f32 %v565_v47, %v490_v46  ;;  %v828_v49 = vpop.f32.mrb[1].mxu1 }
 0x2ec   : > { %v569_v50 = vsub.f32 0.0, %v566_v48 }
 0x2ee   : > { %v570_v51 = vmul.f32 1.442695, %v569_v50 }
 0x2f0   : > { %937 = vpow2.f32 %v570_v51 }
 0x2fa   : > { %v938_v52 = vpop.eup %937 }
 0x2fb   : > { %v572_v53 = vadd.f32 1.0, %v938_v52 }
 0x2fd   : > { %939 = vrcp.f32 %v572_v53 }
 0x307   : > { %v940_v55 = vpop.eup %939 }
 0x308   : > { %v578_v56 = vrot.slane %v940_v55, %v577_v54 }
 0x30a   : > { %584 = vbcast.lane.b32.xlu1 %v578_v56, 264  ;;  %580 = vbcast.lane.b32.xlu0 %v578_v56, 256 }
 0x30e   : > { %588 = vbcast.lane.b32.xlu1 %v578_v56, 272  ;;  %596 = vbcast.lane.b32.xlu0 %v578_v56, 288 }
 0x312   : > { %592 = vbcast.lane.b32.xlu1 %v578_v56, 280  ;;  %604 = vbcast.lane.b32.xlu0 %v578_v56, 304 }
 0x316   : > { %600 = vbcast.lane.b32.xlu1 %v578_v56, 296 }
 0x31a   : > { %608 = vbcast.lane.b32.xlu1 %v578_v56, 312 }
 0x37c   : > { %v585_v57 = vpop.permute.xlu1 %584  ;;  %v581_v58 = vpop.permute.xlu0 %580 }
 0x37d   : > { %v612_v59 = vmul.f32 %v585_v57, %v1450_v5  ;;  %v613_v60 = vmul.f32 %v585_v57, %v1453_v6  ;;  %v610_v61 = vmul.f32 %v581_v58, %v1436_v0  ;;  %v611_v40 = vmul.f32 %v581_v58, %v1439_v1 }
 0x37f   : > { %628 = vst [vmem:[%s1517_s24 + $0x10] sm:$0xff] %v612_v59  ;;  %629 = vst [vmem:[%s1517_s24 + $0x18] sm:$0xff] %v613_v60 }
 0x380   : > { %626 = vst [vmem:[%s1517_s24] sm:$0xff] %v610_v61  ;;  %627 = vst [vmem:[%s1517_s24 + $0x8] sm:$0xff] %v611_v40  ;;  %v589_v5 = vpop.permute.xlu1 %588  ;;  %v597_v0 = vpop.permute.xlu0 %596 }
 0x381   : > { %v614_v1 = vmul.f32 %v589_v5, %v1442_v2  ;;  %v615_v6 = vmul.f32 %v589_v5, %v1447_v4  ;;  %v618_v62 = vmul.f32 %v597_v0, %v1468_v12  ;;  %v619_v63 = vmul.f32 %v597_v0, %v1471_v13 }
 0x383   : > { %630 = vst [vmem:[%s1517_s24 + $0x20] sm:$0xff] %v614_v1  ;;  %631 = vst [vmem:[%s1517_s24 + $0x28] sm:$0xff] %v615_v6 }
 0x384   : > { %634 = vst [vmem:[%s1517_s24 + $0x40] sm:$0xff] %v618_v62  ;;  %635 = vst [vmem:[%s1517_s24 + $0x48] sm:$0xff] %v619_v63  ;;  %v593_v3 = vpop.permute.xlu1 %592  ;;  %v605_v7 = vpop.permute.xlu0 %604 }
 0x385   : > { %v616_v2 = vmul.f32 %v593_v3, %v1458_v8  ;;  %v617_v10 = vmul.f32 %v593_v3, %v1461_v9  ;;  %v622_v4 = vmul.f32 %v605_v7, %v1484_v18  ;;  %v623_v12 = vmul.f32 %v605_v7, %v1487_v19 }
 0x387   : > { %632 = vst [vmem:[%s1517_s24 + $0x30] sm:$0xff] %v616_v2  ;;  %633 = vst [vmem:[%s1517_s24 + $0x38] sm:$0xff] %v617_v10 }
 0x388   : > { %638 = vst [vmem:[%s1517_s24 + $0x60] sm:$0xff] %v622_v4  ;;  %639 = vst [vmem:[%s1517_s24 + $0x68] sm:$0xff] %v623_v12  ;;  %v601_v13 = vpop.permute.xlu1 %600 }
 0x389   : > { %v620_v11 = vmul.f32 %v601_v13, %v1474_v14  ;;  %v621_v16 = vmul.f32 %v601_v13, %v1477_v15 }
 0x38b   : > { %636 = vst [vmem:[%s1517_s24 + $0x50] sm:$0xff] %v620_v11  ;;  %637 = vst [vmem:[%s1517_s24 + $0x58] sm:$0xff] %v621_v16 }
 0x38c   : > { %v609_v8 = vpop.permute.xlu1 %608 }
 0x38d   : > { %v624_v9 = vmul.f32 %v609_v8, %v1490_v20  ;;  %v625_v14 = vmul.f32 %v609_v8, %v1493_v21 }
 0x38f   : > { %640 = vst [vmem:[%s1517_s24 + $0x70] sm:$0xff] %v624_v9  ;;  %641 = vst [vmem:[%s1517_s24 + $0x78] sm:$0xff] %v625_v14 }
 0x390   : > { %1096 = shalt.err (!%p1093_p13)
}
 0x391   : > { %s1097_s13 = scalar_lea.hbm %s1548_s12, 2048  ;;  %s1101_s27 = scalar_lea.hbm %s1603_s5, 4096 }
 0x392   : > { %p1098_p9 = scmp.ne.s32.totalorder %s1548_s12, %s1097_s13  ;;  %p1102_p6 = scmp.lt.u32.totalorder %s1548_s12, %s1603_s5 }
 0x393   : > { %p1103_p4 = scmp.lt.u32.totalorder %s1101_s27, %s1097_s13  ;;  %p1105_p3 = scmp.lt.u32.totalorder %s1097_s13, %s1548_s12 }
 0x394   : > { %p1099_p0 = pnand %p1098_p9, %p1363_p10 }
 0x395   : > { %p1104_p8 = por %p1103_p4, %p1102_p6 }
 0x396   : > { %p1100_p11 = pneg %p1099_p0 }
 0x397   : > { %p1106_p5 = por %p1105_p3, %p1104_p8 }
 0x399   : > { %p1107_p7 = pnand %p1106_p5, %p1100_p11 }
 0x39b   : > { %1110 = shalt.err (!%p1107_p7)
}
 0x39c   : > { %s1172_s26 = smov 256   ;;  %s1173_s11 = smov 16  }
 0x39d   : > { %859 = dma.vmem_to_hbm [thread:$0]  (%p1363_p10), %s1550_s9, 2048, %s1548_s12, %s643_s22, %s1172_s26, %s1172_s26, %s1173_s11  }
 0x39e PF: > { %s671_s8 = sand.u32 1, %s1145_s18   ;;  %p1621_p12 = scmp.ne.s32.totalorder %s1608_s25, 0 }
 0x39f   : > { %p1622_p2 = scmp.ge.s32.totalorder %s1157_s21, 2  ;;  %s672_s23 = scalar_lea.sflag [#allocation4], %s671_s8 }
 0x3a1   : > { %p879_p1 = pnand %p1622_p2, %p1621_p12 }
 0x3a3   : > { %1140 = dma.done.wait (!%p879_p1), %s672_s23, 2048  }
 0x3a4   : > { %1142 = vsyncadd (!%p879_p1), %s672_s23, 4294965248  ;;  %p20_p13 = scmp.ge.s32.totalorder %s1353_s14, 4   ;;  %s1623_s18 = smov %s1149_s19 }
 0x3a5   : > { %s1624_s19 = smov %s1153_s20  ;;  %s1625_s20 = smov %s1369_s28 }
 0x3a6   : > { %s1626_s21 = smov %s1353_s14  ;;  %22 = sbr.rel (!%p20_p13) target bundleno = 7 (0x7), region = 101 }
 0x3ad   :  { %677 = vsyncpa [#allocation3], 1 }
 0x3ae   :  { %679 = vsyncpa [#allocation3 + $0x1], 1 }
 0x3af   :  { %680 = vsyncpa [#allocation6], 1 }
 0x3b0   :  { %681 = vsyncpa [#allocation9], 1 }
 0x3b1   :  { %682 = vsyncpa [#allocation4], 1 }
 0x3b2   :  { %684 = vsyncpa [#allocation4 + $0x1], 1 }

</bundles_post_ra>
